<compile_context>
chip_gen: v6e
topology: v6e:2x2x1
jax: 0.10.0
libtpu: 0.0.40
codegen_flags: <defaults>
</compile_context>

<pallas_src>
import functools

import jax
import jax.numpy as jnp
import numpy as np
from jax.experimental import pallas as pl
from jax.experimental.pallas import tpu as pltpu


# ---------------------------------------------------------------------------
# Parameter setup (plain numpy/JAX) — identical math to the PyTorch __init__.
# ---------------------------------------------------------------------------
def make_positional_encoding(d_model: int, max_len: int = 5000) -> jnp.ndarray:
    position = np.arange(0, max_len, dtype=np.float32)[:, None]              # [L, 1]
    div_term = np.exp(np.arange(0, d_model, 2, dtype=np.float32)
                      * (-np.log(10000.0) / d_model))                        # [D/2]
    pe = np.zeros((max_len, d_model), dtype=np.float32)
    pe[:, 0::2] = np.sin(position * div_term)
    pe[:, 1::2] = np.cos(position * div_term)
    return jnp.asarray(pe[:, None, :])                                       # [L, 1, D]


# ---------------------------------------------------------------------------
# Pallas kernel: broadcast add (+ optional inverted dropout).
#   3-D path: x (ts, B, D) + pe (ts, 1, D)           (broadcast over batch)
#   2-D path: x (ts, B*D)  + tile(pe (ts, D), B)     (in-VMEM broadcast)
# Dropout: bits are uniform int32 over [-2^31, 2^31); keep with prob (1 - p)
# iff bits < keep_thr (keep probability quantized to 2^-32 — negligible bias).
# ---------------------------------------------------------------------------
def _pe_add_kernel(x_ref, pe_ref, *rest, flat: bool, batch: int,
                   keep_thr, keep_scale):
    if keep_thr is not None:
        bits_ref, o_ref = rest
    else:
        (o_ref,) = rest
        bits_ref = None

    pe = pe_ref[...]
    if flat and batch > 1:
        # Widen pe across the batch inside VMEM: keeps the pe HBM stream at 1/B
        # of the x stream.  XLU/copy work is free filler in a mem-bound kernel.
        pe = jnp.tile(pe, (1, batch))
    y = x_ref[...] + pe            # 3-D path broadcasts (ts,1,D) automatically

    if bits_ref is not None:
        keep = bits_ref[...] < jnp.int32(keep_thr)   # signed compare, 1 op
        y = jnp.where(keep, y * keep_scale, 0.0)     # mul + select

    o_ref[...] = y.astype(o_ref.dtype)


# ---------------------------------------------------------------------------
# Tile / VMEM heuristics
# ---------------------------------------------------------------------------
def _round_up(v: int, m: int) -> int:
    return -(-v // m) * m


def _vmem_cap_bytes() -> int:
    """Scoped-VMEM budget: 3/4 of detected physical VMEM, else a v7x-safe 48 MiB."""
    try:
        info = pltpu.get_tpu_info()
        phys = getattr(info, "vmem_capacity_bytes", None)
        if phys:
            return max(32 << 20, min(int(phys) * 3 // 4, 100 << 20))
    except Exception:
        pass
    return 48 << 20


def _pick_seq_tile(seq_len: int, row_bytes: int, *, sublane: int = 8,
                   target_bytes: int = 6 << 20,
                   min_tile_bytes: int = 256 << 10,
                   min_steps: int = 2) -> int:
    """Rows of the seq axis per grid step.

    No exact-divisor requirement (grid uses cdiv; Pallas masks the ragged last
    block).  Result is always a multiple of `sublane`.  Prefers >= `min_steps`
    (even) steps — two TensorCores on v7x + DMA pipeline overlap — as long as
    tiles stay >= min_tile_bytes (or we would otherwise have a single step).
    """
    s_pad = _round_up(seq_len, sublane)
    if s_pad <= sublane:
        return s_pad
    row_bytes = max(row_bytes, 1)
    by_bytes = max(sublane,
                   (max(target_bytes, row_bytes) // row_bytes) // sublane * sublane)
    ts = min(by_bytes, s_pad)
    steps = -(-seq_len // ts)
    want = max(min_steps, steps)
    if want > 1 and want % 2:
        want += 1                      # even step count balances the 2 TCs on v7x
    ts_even = max(sublane, _round_up(-(-seq_len // want), sublane))
    if ts_even != ts and (ts_even * row_bytes >= min_tile_bytes or steps < min_steps):
        ts = ts_even
    return ts


# ---------------------------------------------------------------------------
# Wrapper
# ---------------------------------------------------------------------------
def positional_encoding_forward(x: jnp.ndarray,
                                pe: jnp.ndarray,
                                *,
                                dropout_p: float = 0.1,
                                training: bool = False,
                                rng_key=None) -> jnp.ndarray:
    """x: [seq_len, batch, d_model]; pe: [max_len, 1, d_model] (float32)."""
    S, B, D = x.shape
    L = pe.shape[0]
    dropout_p = float(dropout_p)
    use_dropout = bool(training) and dropout_p > 0.0
    if use_dropout and dropout_p >= 1.0:
        return jnp.zeros_like(x)       # torch nn.Dropout(p=1.0) semantics

    itemsize = jnp.dtype(x.dtype).itemsize
    sublane = {4: 8, 2: 16, 1: 32}.get(itemsize, 8)

    # Layout: natural 3-D when it is already lane-dense and the pe stream needs
    # no in-kernel widening; otherwise flatten (B, D) into one lane axis.
    flat = not (B >= 8 and D % 128 == 0)

    vmem_cap = _vmem_cap_bytes()
    n_big = 3 if use_dropout else 2                        # x, out (+ dropout bits)
    target = max(2 << 20, min(8 << 20, vmem_cap // (4 * n_big)))
    row_bytes = B * D * itemsize
    ts = _pick_seq_tile(S, row_bytes, sublane=sublane, target_bytes=target)
    grid = (pl.cdiv(S, ts),)

    if flat:
        x_in = x.reshape(S, B * D)                          # contiguous, free
        pe_in = pe.reshape(L, D)                            # drops unit dim, free;
                                                            # full table, no [:S] copy
        x_spec = pl.BlockSpec((ts, B * D), lambda i: (i, 0))
        pe_spec = pl.BlockSpec((ts, D), lambda i: (i, 0))
        out_spec = pl.BlockSpec((ts, B * D), lambda i: (i, 0))
        out_sds = jax.ShapeDtypeStruct((S, B * D), x.dtype)
    else:
        x_in = x
        pe_in = pe                                          # full table, no [:S] copy
        x_spec = pl.BlockSpec((ts, B, D), lambda i: (i, 0, 0))
        pe_spec = pl.BlockSpec((ts, 1, D), lambda i: (i, 0, 0))
        out_spec = pl.BlockSpec((ts, B, D), lambda i: (i, 0, 0))
        out_sds = jax.ShapeDtypeStruct((S, B, D), x.dtype)

    inputs = [x_in, pe_in]
    in_specs = [x_spec, pe_spec]
    keep_thr = None
    keep_scale = None
    if use_dropout:
        keep_prob = 1.0 - dropout_p
        # Uniform int32 over [-2^31, 2^31): P(bits < thr) = (thr + 2^31) / 2^32.
        thr = int(round(keep_prob * 4294967296.0)) - 2147483648
        keep_thr = max(-2147483647, min(2147483647, thr))
        keep_scale = 1.0 / keep_prob
        key = rng_key if rng_key is not None else jax.random.PRNGKey(0)
        bits = jax.lax.bitcast_convert_type(
            jax.random.bits(key, x_in.shape, dtype=jnp.uint32), jnp.int32)
        inputs.append(bits)
        in_specs.append(pl.BlockSpec(x_spec.block_shape, x_spec.index_map))

    kernel = functools.partial(_pe_add_kernel, flat=flat, batch=B,
                               keep_thr=keep_thr, keep_scale=keep_scale)

    out = pl.pallas_call(
        kernel,
        out_shape=out_sds,
        grid_spec=pltpu.PrefetchScalarGridSpec(
            num_scalar_prefetch=0,
            grid=grid,
            in_specs=in_specs,
            out_specs=out_spec,
        ),
        compiler_params=pltpu.CompilerParams(
            dimension_semantics=("parallel",),
            vmem_limit_bytes=vmem_cap,
        ),
    )(*inputs)

    return out.reshape(S, B, D) if flat else out


# ---------------------------------------------------------------------------
# Demo / correctness check
# ---------------------------------------------------------------------------
if __name__ == "__main__":
    # Small shapes implied by the module: [seq_len, batch, d_model].
    d_model, seq_len, batch, max_len = 32, 8, 2, 64

    key = jax.random.PRNGKey(0)
    x = jax.random.normal(key, (seq_len, batch, d_model), dtype=jnp.float32)
    pe = make_positional_encoding(d_model, max_len)
    ref = x + pe[:seq_len]

    # Eval mode (dropout is identity) on the flattened path (B < 8, D < 128).
    out = jax.block_until_ready(
        positional_encoding_forward(x, pe, dropout_p=0.1, training=False))
    assert out.shape == (seq_len, batch, d_model)
    assert jnp.allclose(out, ref, atol=1e-6, rtol=1e-6)

    # Eval mode on the natural lane-dense 3-D path (B >= 8, D % 128 == 0).
    s2, b2, d2 = 16, 8, 128
    x2 = jax.random.normal(jax.random.PRNGKey(1), (s2, b2, d2), dtype=jnp.float32)
    pe2 = make_positional_encoding(d2, 64)
    out2 = jax.block_until_ready(
        positional_encoding_forward(x2, pe2, dropout_p=0.1, training=False))
    assert jnp.allclose(out2, x2 + pe2[:s2], atol=1e-6, rtol=1e-6)

    # Training mode (flatten path): every element is 0 or (x + pe) / (1 - p).
    # (Exact mask bits differ from torch's RNG; inverted-dropout semantics match.)
    p = 0.5
    out_tr = jax.block_until_ready(positional_encoding_forward(
        x, pe, dropout_p=p, training=True, rng_key=jax.random.PRNGKey(42)))
    scaled = ref / (1.0 - p)
    is_zero = jnp.isclose(out_tr, 0.0, atol=1e-6)
    is_kept = jnp.isclose(out_tr, scaled, atol=1e-5, rtol=1e-5)
    assert bool(jnp.all(jnp.logical_or(is_zero, is_kept)))
    n_kept = int(jnp.sum(is_kept & ~is_zero))
    assert 0 < n_kept < out_tr.size          # some dropped, some kept

    print("KERNEL_OK")
</pallas_src>

<mosaic_0001>
module attributes {stable_mosaic.version = 11 : i64} {
  func.func @_pe_add_kernel(%arg0: i32, %arg1: memref<8x64xf32, #tpu.memory_space<vmem>>, %arg2: memref<8x32xf32, #tpu.memory_space<vmem>>, %arg3: memref<8x64xf32, #tpu.memory_space<vmem>>) attributes {dimension_semantics = [#tpu.dimension_semantics<parallel>], iteration_bounds = array<i64: 1>, scalar_prefetch = 0 : i64, scratch_operands = 0 : i64, tpu.core_type = #tpu.core_type<tc>, window_params = [{transform_indices = @transform_0, window_bounds = array<i64: 8, 64>}, {transform_indices = @transform_1, window_bounds = array<i64: 8, 32>}, {transform_indices = @transform_2, window_bounds = array<i64: 8, 64>}]} {
    %c0 = arith.constant 0 : index
    %c0_0 = arith.constant 0 : index
    %0 = vector.load %arg2[%c0, %c0_0] : memref<8x32xf32, #tpu.memory_space<vmem>>, vector<8x32xf32>
    %1 = tpu.concatenate %0, %0 in 1 : vector<8x32xf32>, vector<8x32xf32> -> vector<8x64xf32>
    %c0_1 = arith.constant 0 : index
    %c0_2 = arith.constant 0 : index
    %2 = vector.load %arg1[%c0_1, %c0_2] : memref<8x64xf32, #tpu.memory_space<vmem>>, vector<8x64xf32>
    %3 = arith.addf %2, %1 : vector<8x64xf32>
    %c0_3 = arith.constant 0 : index
    %c0_4 = arith.constant 0 : index
    %4 = vector.load %arg3[%c0_3, %c0_4] : memref<8x64xf32, #tpu.memory_space<vmem>>, vector<8x64xf32>
    tpu.vector_store %arg3[%c0_3, %c0_4], %3 {strides = array<i32>} : memref<8x64xf32, #tpu.memory_space<vmem>>, vector<8x64xf32>,
    return
  }
  func.func @transform_0(%arg0: i32) -> (i32, i32) {
    %c0_i32 = arith.constant 0 : i32
    %c0_i32_0 = arith.constant 0 : i32
    return %arg0, %c0_i32 : i32, i32
  }
  func.func @transform_1(%arg0: i32) -> (i32, i32) {
    %c0_i32 = arith.constant 0 : i32
    %c0_i32_0 = arith.constant 0 : i32
    return %arg0, %c0_i32 : i32, i32
  }
  func.func @transform_2(%arg0: i32) -> (i32, i32) {
    %c0_i32 = arith.constant 0 : i32
    %c0_i32_0 = arith.constant 0 : i32
    return %arg0, %c0_i32 : i32, i32
  }
}

</mosaic_0001>

<bundles_post_ra>
// kernel: tpu_custom_call.1
= control target key start
LH: loop header
LB: loop body
LE: loop exit
PB: predicated region body
PF: predicated region fallthrough
CT: control target
= control target key end

     0   :  { %s87_s0 = inlined_call_operand.vmem [shape: f32[8,64], index: 0, kind: input, shape index: {}]   ;;  %s88_s1 = inlined_call_operand.vmem [shape: f32[64,32], index: 1, kind: input, shape index: {}]   ;;  %s89_s2 = inlined_call_operand.hbm [shape: f32[8,64], index: 2, kind: output, shape index: {}]  }
   0x1   :  { %v12_v0 = vld [vmem:[%s88_s1] sm:$0xff] }
   0x2   :  { %7 = vsyncpa [#allocation3], 0  ;;  %s61_s11 = smov 32   ;;  %vm17_vm0 = vcmask 261120   ;;  %v19_v1 = vld [vmem:[%s87_s0] sm:$0xff]  ;;  %s62_s14 = smov [#allocation2]  }
   0x3   :  { %14 = vrot.lane.b32.xlu0 %v12_v0, %s61_s11  ;;  %s29_s15 = sshll.u32 %s62_s14, 4  ;;  %vm21_vm1 = vcmask 523264   ;;  %s30_s15 = int_to_ptr.vmem [resolvable:$true] %s29_s15 }
   0x4   :  { %s39_s16 = scalar_lea.vmem %s30_s15, 128  ;;  %p44_p1 = scmp.lt.s32.totalorder %s30_s15, %s30_s15 }
   0x5   :  { %p40_p0 = scmp.ne.s32.totalorder %s30_s15, %s39_s16  ;;  %p45_p2 = scmp.lt.s32.totalorder %s39_s16, %s39_s16 }
   0x7   :  { %p46_p3 = por %p45_p2, %p44_p1 }
   0x9   :  { %p47_p4 = pnand %p46_p3, %p40_p0 }
  0x75   :  { %v15_v2 = vpop.permute.xlu0 %14 }
  0x76   :  { %v18_v3 = vsel %vm17_vm0, %v12_v0, %v15_v2 }
  0x77   :  { %v20_v4 = vadd.f32 %v19_v1, %v18_v3 }
  0x79   :  { %22 = vst.msk [vmem:[#allocation2] sm:$0xff] %vm21_vm1, %v20_v4 }
  0x7a   :  { %50 = shalt.err (!%p47_p4)
}
  0x7b   :  { %32 = dma.vmem_to_hbm [thread:$0]  %s30_s15, 128, %s89_s2, [#allocation3]  }
  0x7c   :  { %59 = dma.done.wait [#allocation3], 128  }
  0x7d   :  { %60 = vsyncadd [#allocation3], 4294967168 }
  0x7e   :  { %36 = vsyncpa [#allocation3], 1 }

</bundles_post_ra>
